<compile_context>
chip_gen: v7x
topology: tpu7x:2x2x1
jax: 0.10.0
libtpu: 0.0.40
codegen_flags: <defaults>
</compile_context>

<pallas_src>
import functools

import jax
import jax.numpy as jnp
from jax import lax
from jax.experimental import pallas as pl
from jax.experimental.pallas import tpu as pltpu

LN_EPS = 1e-5
_INV_SQRT2 = 0.7071067811865476          # 1/sqrt(2)
_SQRT_2_OVER_PI = 0.7978845608028654     # sqrt(2/pi)


def _gelu(h, approximate):
    if approximate:
        # tanh approximation (PyTorch GELU(approximate='tanh')): the tanh runs
        # on the EUP slot instead of a long erf polynomial on the VALU.
        return 0.5 * h * (1.0 + jnp.tanh(_SQRT_2_OVER_PI * (h + 0.044715 * h * h * h)))
    # Exact erf form == PyTorch nn.GELU() default.
    return 0.5 * h * (1.0 + lax.erf(h * _INV_SQRT2))


def mlpc_kernel(x_ref, g_ref, beta_ref, w1_ref, b1_ref, w2_ref, b2_ref, o_ref,
                *, h_chunk, num_h_chunks, approximate_gelu):
    """One (tile_m, D) token tile: LN -> fc1 -> GELU -> fc2 -> + residual.

    Token-major: tokens on sublanes, features (D) on lanes. Weights / LN params
    arrive as whole-array VMEM-resident blocks with constant index maps.
    """
    x = x_ref[...].astype(jnp.float32)

    # LayerNorm over the feature (lane) axis -- biased variance, as nn.LayerNorm.
    mean = jnp.mean(x, axis=-1, keepdims=True)
    centered = x - mean
    var = jnp.mean(centered * centered, axis=-1, keepdims=True)
    xn = centered * lax.rsqrt(var + LN_EPS)
    xn = (xn * g_ref[...] + beta_ref[...]).astype(w1_ref.dtype)   # MXU operand dtype
    del x, mean, centered, var   # don't keep extra f32 copies live across the matmuls

    def h_block(lo):
        hi = lo + h_chunk
        h = jnp.dot(xn, w1_ref[:, lo:hi], preferred_element_type=jnp.float32)
        h = h + b1_ref[:, lo:hi]
        # NOTE: on v6e/v7x this bias-add + GELU could run in bf16 (bf16 VPU/EUP)
        #       to halve vreg traffic; kept in f32 for v5e compatibility.
        h = _gelu(h, approximate_gelu)
        return jnp.dot(h.astype(w2_ref.dtype), w2_ref[lo:hi, :],
                       preferred_element_type=jnp.float32)

    # Fully-unrolled static H-chunk loop: only a (tile_m, h_chunk) slice of the
    # GELU intermediate is live at a time (never a full (tile_m, H) f32 tensor),
    # and the weight slices are static, zero-cost ref views.
    y = h_block(0)
    for c in range(1, num_h_chunks):
        y = y + h_block(c * h_chunk)

    # Residual re-reads the input tile (its VMEM buffer already holds the data).
    o_ref[...] = (y + b2_ref[...] + x_ref[...].astype(jnp.float32)).astype(o_ref.dtype)


def _pick_token_tile(n_tokens, tm_req):
    """Token-tile size: multiple of 8 sublanes, >= 2 grid steps when possible."""
    tm = max(8, min(int(tm_req), n_tokens))
    tm = ((tm + 7) // 8) * 8
    # v7x has 2 TensorCores per chip: make sure the "parallel" token axis has at
    # least two grid steps so both cores get work (harmless on v5e/v6e).
    if n_tokens > 8 and pl.cdiv(n_tokens, tm) < 2:
        tm = ((pl.cdiv(n_tokens, 2) + 7) // 8) * 8
    return tm


def _pick_h_chunk(hidden, hc_req):
    """Hidden-dim chunking for the in-kernel loop (multiples of 128 lanes)."""
    if hc_req is None or int(hc_req) >= hidden:
        return hidden, 1
    hc = max(128, (int(hc_req) // 128) * 128)
    if hc >= hidden or hidden % hc != 0:
        # TODO(synk): hidden dims that aren't a multiple of the chunk fall back
        #             to a single chunk (typical widths are 128-aligned).
        return hidden, 1
    return hc, hidden // hc


@functools.partial(
    jax.jit,
    static_argnames=("tm", "h_chunk", "mxu_dtype", "approximate_gelu",
                     "single_buffer_params"))
def _mlpc_call(x, gamma, beta, w1, b1, w2, b2, *, tm, h_chunk, mxu_dtype,
               approximate_gelu, single_buffer_params):
    B, S, D = x.shape
    H = w1.shape[1]
    N = B * S

    # Token-major (N, D): a free reshape -- no transposes, no padding.
    x2 = x.reshape(N, D)

    tile_m = _pick_token_tile(N, tm)
    grid = (pl.cdiv(N, tile_m),)          # tail block handled by masked writes
    hc, n_chunks = _pick_h_chunk(H, h_chunk)

    # Parameters: cast / reshape once in the wrapper (outside the grid loop).
    w1c = w1.astype(mxu_dtype)                        # (D, H)
    w2c = w2.astype(mxu_dtype)                        # (H, D)
    gamma2 = gamma.reshape(1, D).astype(jnp.float32)
    beta2 = beta.reshape(1, D).astype(jnp.float32)
    b1_2 = b1.reshape(1, H).astype(jnp.float32)
    b2_2 = b2.reshape(1, D).astype(jnp.float32)

    def const_spec(shape):
        # Constant index map => DMA'd once, VMEM-resident across the whole grid.
        index_map = lambda i: (0,) * len(shape)
        if single_buffer_params:
            # Pin to a single buffer: resident params never change, so default
            # double-buffering would only waste VMEM (16 MiB dead space at
            # D=1024/H=4096 bf16 -- a quarter of v7x's physical VMEM).
            return pl.BlockSpec(shape, index_map, pipeline_mode=pl.Buffered(1))
        return pl.BlockSpec(shape, index_map)

    # Explicit scoped-VMEM limit (v5e's default is only 16 MiB); sized from the
    # actual working set with headroom, floored at the 32 MiB default.
    w_bytes = 2 * D * H * jnp.dtype(mxu_dtype).itemsize + (3 * D + H) * 4
    if not single_buffer_params:
        w_bytes *= 2
    act_bytes = 2 * 2 * tile_m * D * x.dtype.itemsize        # x & out, double-buffered
    work_bytes = tile_m * (2 * D + 2 * hc) * 4               # xn / h-chunk / acc
    vmem_limit = int(min(max(int(1.5 * (w_bytes + act_bytes + work_bytes)),
                             32 * 1024 * 1024), 128 * 1024 * 1024))

    kernel = functools.partial(mlpc_kernel, h_chunk=hc, num_h_chunks=n_chunks,
                               approximate_gelu=approximate_gelu)

    out = pl.pallas_call(
        kernel,
        out_shape=jax.ShapeDtypeStruct((N, D), x.dtype),
        grid=grid,
        in_specs=[
            pl.BlockSpec((tile_m, D), lambda i: (i, 0)),     # x token tile
            const_spec((1, D)),                              # gamma
            const_spec((1, D)),                              # beta
            const_spec((D, H)),                              # W1
            const_spec((1, H)),                              # b1
            const_spec((H, D)),                              # W2
            const_spec((1, D)),                              # b2
        ],
        out_specs=pl.BlockSpec((tile_m, D), lambda i: (i, 0)),
        compiler_params=pltpu.CompilerParams(
            dimension_semantics=("parallel",),               # shards tokens across TCs
            vmem_limit_bytes=vmem_limit),
    )(x2, gamma2, beta2, w1c, b1_2, w2c, b2_2)

    return out.reshape(B, S, D)


# One-time feature probes (JAX-version compatibility; see mlpc_forward).
_SINGLE_BUFFER_PARAMS_OK = True     # pl.Buffered(1) pinning of resident params
_EXACT_GELU_OK = True               # lax.erf lowering inside Mosaic


def mlpc_forward(x, gamma, beta, w1, b1, w2, b2, *, tm=512, h_chunk=512,
                 mxu_dtype=jnp.bfloat16, approximate_gelu=False):
    """MLPC forward (do_conv=False, use_residual=True).

    x: (B, S, D). w1: (D, H), w2: (H, D) -- the transpose of nn.Linear.weight.
    mxu_dtype controls matmul operand dtype only (accumulation is always f32).
    tm ~512 suits v5e/v6e; use ~256-384 on v7x if VMEM-limited at large D/H.
    """
    global _SINGLE_BUFFER_PARAMS_OK, _EXACT_GELU_OK
    if not _EXACT_GELU_OK:
        approximate_gelu = True
    last_err = None
    for sb in ((True, False) if _SINGLE_BUFFER_PARAMS_OK else (False,)):
        try:
            return jax.block_until_ready(
                _mlpc_call(x, gamma, beta, w1, b1, w2, b2, tm=tm,
                           h_chunk=h_chunk, mxu_dtype=mxu_dtype,
                           approximate_gelu=approximate_gelu,
                           single_buffer_params=sb))
        except Exception as err:          # pragma: no cover (version compat)
            last_err = err
            if sb:
                _SINGLE_BUFFER_PARAMS_OK = False
    if not approximate_gelu:
        # TODO(synk): if lax.erf has no Mosaic lowering in this JAX version we
        #             fall back to the tanh GELU (<~1e-3 deviation from nn.GELU()).
        try:
            out = jax.block_until_ready(
                _mlpc_call(x, gamma, beta, w1, b1, w2, b2, tm=tm,
                           h_chunk=h_chunk, mxu_dtype=mxu_dtype,
                           approximate_gelu=True, single_buffer_params=False))
            _EXACT_GELU_OK = False
            return out
        except Exception:                 # pragma: no cover
            pass
    raise last_err


def mlpc_reference(x, gamma, beta, w1, b1, w2, b2, *, mxu_dtype=jnp.float32,
                   approximate_gelu=False):
    """Pure-JAX reference (f32 LayerNorm, HIGHEST-precision matmuls)."""
    xf = x.astype(jnp.float32)
    mean = jnp.mean(xf, axis=-1, keepdims=True)
    var = jnp.mean((xf - mean) ** 2, axis=-1, keepdims=True)
    xn = (xf - mean) * lax.rsqrt(var + LN_EPS) * gamma + beta
    h = jnp.dot(xn.astype(mxu_dtype), w1.astype(mxu_dtype),
                preferred_element_type=jnp.float32,
                precision=lax.Precision.HIGHEST) + b1
    h = _gelu(h, approximate_gelu)
    y = jnp.dot(h.astype(mxu_dtype), w2.astype(mxu_dtype),
                preferred_element_type=jnp.float32,
                precision=lax.Precision.HIGHEST) + b2
    return (y + xf).astype(x.dtype)


if __name__ == "__main__":
    # MLPC(in_dim=32, out_dim=32, hidden_dim=64, do_conv=False, use_residual=True)
    # TODO(synk): do_conv=True (Conv1d 1x1, no LayerNorm) is the same per-position
    #             matmul; only the default Linear path is implemented here.
    B, S, D, H = 2, 8, 32, 64

    key = jax.random.PRNGKey(0)
    kx, kg, kb, kw1, kb1, kw2, kb2 = jax.random.split(key, 7)

    x = jax.random.normal(kx, (B, S, D), dtype=jnp.float32)
    gamma = 1.0 + 0.1 * jax.random.normal(kg, (D,), dtype=jnp.float32)
    beta = 0.1 * jax.random.normal(kb, (D,), dtype=jnp.float32)
    w1 = jax.random.normal(kw1, (D, H), dtype=jnp.float32) / jnp.sqrt(D)
    b1 = 0.01 * jax.random.normal(kb1, (H,), dtype=jnp.float32)
    w2 = jax.random.normal(kw2, (H, D), dtype=jnp.float32) / jnp.sqrt(H)
    b2 = 0.01 * jax.random.normal(kb2, (D,), dtype=jnp.float32)

    # Tolerances are 1e-2 throughout: matmul precision modes differ slightly
    # between the MXU path and the XLA reference; real layout/semantics bugs
    # produce errors orders of magnitude larger.
    TOL = dict(atol=1e-2, rtol=1e-2)

    # 1) f32 MXU operands vs exact (erf-GELU) reference.
    out = mlpc_forward(x, gamma, beta, w1, b1, w2, b2, mxu_dtype=jnp.float32)
    out = jax.block_until_ready(out)
    ref = mlpc_reference(x, gamma, beta, w1, b1, w2, b2)
    assert out.shape == (B, S, D)
    assert jnp.allclose(out, ref, **TOL), float(jnp.max(jnp.abs(out - ref)))

    # 2) Default path (bf16 MXU operands, f32 accumulation) vs matched reference.
    out_bf = jax.block_until_ready(mlpc_forward(x, gamma, beta, w1, b1, w2, b2))
    ref_bf = mlpc_reference(x, gamma, beta, w1, b1, w2, b2, mxu_dtype=jnp.bfloat16)
    assert jnp.allclose(out_bf, ref_bf, **TOL), \
        float(jnp.max(jnp.abs(out_bf - ref_bf)))

    # 3) Partial tail block: N=200 tokens with a 64-token tile (masked writes).
    x_big = jax.random.normal(kx, (2, 100, D), dtype=jnp.float32)
    out_big = jax.block_until_ready(
        mlpc_forward(x_big, gamma, beta, w1, b1, w2, b2, tm=64,
                     mxu_dtype=jnp.float32))
    ref_big = mlpc_reference(x_big, gamma, beta, w1, b1, w2, b2)
    assert jnp.allclose(out_big, ref_big, **TOL), \
        float(jnp.max(jnp.abs(out_big - ref_big)))

    # 4) H-chunked inner loop (2 chunks of 128) + tanh-approx GELU option.
    D2, H2 = 128, 256
    k2 = jax.random.split(key, 8)
    x2 = jax.random.normal(k2[0], (1, 256, D2), dtype=jnp.float32)
    g2 = 1.0 + 0.1 * jax.random.normal(k2[1], (D2,), dtype=jnp.float32)
    be2 = 0.1 * jax.random.normal(k2[2], (D2,), dtype=jnp.float32)
    w1b = jax.random.normal(k2[3], (D2, H2), dtype=jnp.float32) / jnp.sqrt(D2)
    b1b = 0.01 * jax.random.normal(k2[4], (H2,), dtype=jnp.float32)
    w2b = jax.random.normal(k2[5], (H2, D2), dtype=jnp.float32) / jnp.sqrt(H2)
    b2b = 0.01 * jax.random.normal(k2[6], (D2,), dtype=jnp.float32)
    out2 = jax.block_until_ready(
        mlpc_forward(x2, g2, be2, w1b, b1b, w2b, b2b, h_chunk=128,
                     mxu_dtype=jnp.float32, approximate_gelu=True))
    ref2 = mlpc_reference(x2, g2, be2, w1b, b1b, w2b, b2b, approximate_gelu=True)
    assert jnp.allclose(out2, ref2, **TOL), \
        float(jnp.max(jnp.abs(out2 - ref2)))

    print("KERNEL_OK")
</pallas_src>

<mosaic_0001>
module attributes {stable_mosaic.version = 11 : i64} {
  func.func @mlpc_kernel(%arg0: i32, %arg1: memref<8x32xf32, #tpu.memory_space<vmem>>, %arg2: memref<1x32xf32, #tpu.memory_space<vmem>>, %arg3: memref<1x32xf32, #tpu.memory_space<vmem>>, %arg4: memref<32x64xf32, #tpu.memory_space<vmem>>, %arg5: memref<1x64xf32, #tpu.memory_space<vmem>>, %arg6: memref<64x32xf32, #tpu.memory_space<vmem>>, %arg7: memref<1x32xf32, #tpu.memory_space<vmem>>, %arg8: memref<8x32xf32, #tpu.memory_space<vmem>>) attributes {dimension_semantics = [#tpu.dimension_semantics<parallel>], iteration_bounds = array<i64: 2>, scalar_prefetch = 0 : i64, scratch_operands = 0 : i64, tpu.core_type = #tpu.core_type<tc>, window_params = [{transform_indices = @transform_0, window_bounds = array<i64: 8, 32>}, {pipeline_mode = #tpu.pipeline_mode<synchronous>, transform_indices = @transform_1, window_bounds = array<i64: 1, 32>}, {pipeline_mode = #tpu.pipeline_mode<synchronous>, transform_indices = @transform_2, window_bounds = array<i64: 1, 32>}, {pipeline_mode = #tpu.pipeline_mode<synchronous>, transform_indices = @transform_3, window_bounds = array<i64: 32, 64>}, {pipeline_mode = #tpu.pipeline_mode<synchronous>, transform_indices = @transform_4, window_bounds = array<i64: 1, 64>}, {pipeline_mode = #tpu.pipeline_mode<synchronous>, transform_indices = @transform_5, window_bounds = array<i64: 64, 32>}, {pipeline_mode = #tpu.pipeline_mode<synchronous>, transform_indices = @transform_6, window_bounds = array<i64: 1, 32>}, {transform_indices = @transform_7, window_bounds = array<i64: 8, 32>}]} {
    %c0 = arith.constant 0 : index
    %c0_0 = arith.constant 0 : index
    %0 = vector.load %arg1[%c0, %c0_0] : memref<8x32xf32, #tpu.memory_space<vmem>>, vector<8x32xf32>
    %cst = arith.constant dense<0.000000e+00> : vector<8xf32>
    %1 = vector.multi_reduction <add>, %0, %cst [1] : vector<8x32xf32> to vector<8xf32>
    %2 = vector.shape_cast %1 : vector<8xf32> to vector<8x1xf32>
    %cst_1 = arith.constant 3.200000e+01 : f32
    %3 = vector.broadcast %cst_1 : f32 to vector<8x1xf32>
    %4 = arith.divf %2, %3 : vector<8x1xf32>
    %5 = vector.broadcast %4 : vector<8x1xf32> to vector<8x32xf32>
    %6 = arith.subf %0, %5 : vector<8x32xf32>
    %7 = arith.mulf %6, %6 : vector<8x32xf32>
    %cst_2 = arith.constant dense<0.000000e+00> : vector<8xf32>
    %8 = vector.multi_reduction <add>, %7, %cst_2 [1] : vector<8x32xf32> to vector<8xf32>
    %9 = vector.shape_cast %8 : vector<8xf32> to vector<8x1xf32>
    %cst_3 = arith.constant 3.200000e+01 : f32
    %10 = vector.broadcast %cst_3 : f32 to vector<8x1xf32>
    %11 = arith.divf %9, %10 : vector<8x1xf32>
    %cst_4 = arith.constant 9.99999974E-6 : f32
    %12 = vector.broadcast %cst_4 : f32 to vector<8x1xf32>
    %13 = arith.addf %11, %12 : vector<8x1xf32>
    %14 = math.rsqrt %13 : vector<8x1xf32>
    %15 = vector.broadcast %14 : vector<8x1xf32> to vector<8x32xf32>
    %16 = arith.mulf %6, %15 : vector<8x32xf32>
    %c0_5 = arith.constant 0 : index
    %c0_6 = arith.constant 0 : index
    %17 = vector.load %arg2[%c0_5, %c0_6] : memref<1x32xf32, #tpu.memory_space<vmem>>, vector<1x32xf32>
    %18 = vector.broadcast %17 : vector<1x32xf32> to vector<8x32xf32>
    %19 = arith.mulf %16, %18 : vector<8x32xf32>
    %c0_7 = arith.constant 0 : index
    %c0_8 = arith.constant 0 : index
    %20 = vector.load %arg3[%c0_7, %c0_8] : memref<1x32xf32, #tpu.memory_space<vmem>>, vector<1x32xf32>
    %21 = vector.broadcast %20 : vector<1x32xf32> to vector<8x32xf32>
    %22 = arith.addf %19, %21 : vector<8x32xf32>
    %c0_9 = arith.constant 0 : index
    %c0_10 = arith.constant 0 : index
    %23 = vector.load %arg4[%c0_9, %c0_10] : memref<32x64xf32, #tpu.memory_space<vmem>>, vector<32x64xf32>
    %cst_11 = arith.constant dense<0.000000e+00> : vector<8x64xf32>
    %24 = tpu.matmul %22, %23, %cst_11 {dimension_numbers = #tpu.dot_dimension_numbers<[1], [0], [0], [1], [0, 0, 1, 1], [], []>} : vector<8x32xf32>, vector<32x64xf32>, vector<8x64xf32> -> vector<8x64xf32>
    %c0_12 = arith.constant 0 : index
    %c0_13 = arith.constant 0 : index
    %25 = vector.load %arg5[%c0_12, %c0_13] : memref<1x64xf32, #tpu.memory_space<vmem>>, vector<1x64xf32>
    %26 = vector.broadcast %25 : vector<1x64xf32> to vector<8x64xf32>
    %27 = arith.addf %24, %26 : vector<8x64xf32>
    %cst_14 = arith.constant 5.000000e-01 : f32
    %28 = vector.broadcast %cst_14 : f32 to vector<8x64xf32>
    %29 = arith.mulf %28, %27 : vector<8x64xf32>
    %cst_15 = arith.constant 0.707106769 : f32
    %30 = vector.broadcast %cst_15 : f32 to vector<8x64xf32>
    %31 = arith.mulf %27, %30 : vector<8x64xf32>
    %32 = math.erf %31 : vector<8x64xf32>
    %cst_16 = arith.constant 1.000000e+00 : f32
    %33 = vector.broadcast %cst_16 : f32 to vector<8x64xf32>
    %34 = arith.addf %33, %32 : vector<8x64xf32>
    %35 = arith.mulf %29, %34 : vector<8x64xf32>
    %c0_17 = arith.constant 0 : index
    %c0_18 = arith.constant 0 : index
    %36 = vector.load %arg6[%c0_17, %c0_18] : memref<64x32xf32, #tpu.memory_space<vmem>>, vector<64x32xf32>
    %cst_19 = arith.constant dense<0.000000e+00> : vector<8x32xf32>
    %37 = tpu.matmul %35, %36, %cst_19 {dimension_numbers = #tpu.dot_dimension_numbers<[1], [0], [0], [1], [0, 0, 1, 1], [], []>} : vector<8x64xf32>, vector<64x32xf32>, vector<8x32xf32> -> vector<8x32xf32>
    %c0_20 = arith.constant 0 : index
    %c0_21 = arith.constant 0 : index
    %38 = vector.load %arg7[%c0_20, %c0_21] : memref<1x32xf32, #tpu.memory_space<vmem>>, vector<1x32xf32>
    %39 = vector.broadcast %38 : vector<1x32xf32> to vector<8x32xf32>
    %40 = arith.addf %37, %39 : vector<8x32xf32>
    %c0_22 = arith.constant 0 : index
    %c0_23 = arith.constant 0 : index
    %41 = vector.load %arg1[%c0_22, %c0_23] : memref<8x32xf32, #tpu.memory_space<vmem>>, vector<8x32xf32>
    %42 = arith.addf %40, %41 : vector<8x32xf32>
    %c0_24 = arith.constant 0 : index
    %c0_25 = arith.constant 0 : index
    %43 = vector.load %arg8[%c0_24, %c0_25] : memref<8x32xf32, #tpu.memory_space<vmem>>, vector<8x32xf32>
    tpu.vector_store %arg8[%c0_24, %c0_25], %42 {strides = array<i32>} : memref<8x32xf32, #tpu.memory_space<vmem>>, vector<8x32xf32>,
    return
  }
  func.func @transform_0(%arg0: i32) -> (i32, i32) {
    %c0_i32 = arith.constant 0 : i32
    %c0_i32_0 = arith.constant 0 : i32
    return %arg0, %c0_i32 : i32, i32
  }
  func.func @transform_1(%arg0: i32) -> (i32, i32) {
    %c0_i32 = arith.constant 0 : i32
    %c0_i32_0 = arith.constant 0 : i32
    %c0_i32_1 = arith.constant 0 : i32
    return %c0_i32, %c0_i32_0 : i32, i32
  }
  func.func @transform_2(%arg0: i32) -> (i32, i32) {
    %c0_i32 = arith.constant 0 : i32
    %c0_i32_0 = arith.constant 0 : i32
    %c0_i32_1 = arith.constant 0 : i32
    return %c0_i32, %c0_i32_0 : i32, i32
  }
  func.func @transform_3(%arg0: i32) -> (i32, i32) {
    %c0_i32 = arith.constant 0 : i32
    %c0_i32_0 = arith.constant 0 : i32
    %c0_i32_1 = arith.constant 0 : i32
    return %c0_i32, %c0_i32_0 : i32, i32
  }
  func.func @transform_4(%arg0: i32) -> (i32, i32) {
    %c0_i32 = arith.constant 0 : i32
    %c0_i32_0 = arith.constant 0 : i32
    %c0_i32_1 = arith.constant 0 : i32
    return %c0_i32, %c0_i32_0 : i32, i32
  }
  func.func @transform_5(%arg0: i32) -> (i32, i32) {
    %c0_i32 = arith.constant 0 : i32
    %c0_i32_0 = arith.constant 0 : i32
    %c0_i32_1 = arith.constant 0 : i32
    return %c0_i32, %c0_i32_0 : i32, i32
  }
  func.func @transform_6(%arg0: i32) -> (i32, i32) {
    %c0_i32 = arith.constant 0 : i32
    %c0_i32_0 = arith.constant 0 : i32
    %c0_i32_1 = arith.constant 0 : i32
    return %c0_i32, %c0_i32_0 : i32, i32
  }
  func.func @transform_7(%arg0: i32) -> (i32, i32) {
    %c0_i32 = arith.constant 0 : i32
    %c0_i32_0 = arith.constant 0 : i32
    return %arg0, %c0_i32 : i32, i32
  }
}

module attributes {stable_mosaic.version = 11 : i64} {
  func.func @mlpc_kernel(%arg0: i32, %arg1: memref<8x32xf32, #tpu.memory_space<vmem>>, %arg2: memref<1x32xf32, #tpu.memory_space<vmem>>, %arg3: memref<1x32xf32, #tpu.memory_space<vmem>>, %arg4: memref<32x64xf32, #tpu.memory_space<vmem>>, %arg5: memref<1x64xf32, #tpu.memory_space<vmem>>, %arg6: memref<64x32xf32, #tpu.memory_space<vmem>>, %arg7: memref<1x32xf32, #tpu.memory_space<vmem>>, %arg8: memref<8x32xf32, #tpu.memory_space<vmem>>) attributes {dimension_semantics = [#tpu.dimension_semantics<parallel>], iteration_bounds = array<i64: 2>, scalar_prefetch = 0 : i64, scratch_operands = 0 : i64, tpu.core_type = #tpu.core_type<tc>, window_params = [{transform_indices = @transform_0, window_bounds = array<i64: 8, 32>}, {pipeline_mode = #tpu.pipeline_mode<synchronous>, transform_indices = @transform_1, window_bounds = array<i64: 1, 32>}, {pipeline_mode = #tpu.pipeline_mode<synchronous>, transform_indices = @transform_2, window_bounds = array<i64: 1, 32>}, {pipeline_mode = #tpu.pipeline_mode<synchronous>, transform_indices = @transform_3, window_bounds = array<i64: 32, 64>}, {pipeline_mode = #tpu.pipeline_mode<synchronous>, transform_indices = @transform_4, window_bounds = array<i64: 1, 64>}, {pipeline_mode = #tpu.pipeline_mode<synchronous>, transform_indices = @transform_5, window_bounds = array<i64: 64, 32>}, {pipeline_mode = #tpu.pipeline_mode<synchronous>, transform_indices = @transform_6, window_bounds = array<i64: 1, 32>}, {transform_indices = @transform_7, window_bounds = array<i64: 8, 32>}]} {
    %c0 = arith.constant 0 : index
    %c0_0 = arith.constant 0 : index
    %0 = vector.load %arg1[%c0, %c0_0] : memref<8x32xf32, #tpu.memory_space<vmem>>, vector<8x32xf32>
    %cst = arith.constant dense<0.000000e+00> : vector<8xf32>
    %1 = vector.multi_reduction <add>, %0, %cst [1] : vector<8x32xf32> to vector<8xf32>
    %2 = vector.shape_cast %1 : vector<8xf32> to vector<8x1xf32>
    %cst_1 = arith.constant 3.200000e+01 : f32
    %3 = vector.broadcast %cst_1 : f32 to vector<8x1xf32>
    %4 = arith.divf %2, %3 : vector<8x1xf32>
    %5 = vector.broadcast %4 : vector<8x1xf32> to vector<8x32xf32>
    %6 = arith.subf %0, %5 : vector<8x32xf32>
    %7 = arith.mulf %6, %6 : vector<8x32xf32>
    %cst_2 = arith.constant dense<0.000000e+00> : vector<8xf32>
    %8 = vector.multi_reduction <add>, %7, %cst_2 [1] : vector<8x32xf32> to vector<8xf32>
    %9 = vector.shape_cast %8 : vector<8xf32> to vector<8x1xf32>
    %cst_3 = arith.constant 3.200000e+01 : f32
    %10 = vector.broadcast %cst_3 : f32 to vector<8x1xf32>
    %11 = arith.divf %9, %10 : vector<8x1xf32>
    %cst_4 = arith.constant 9.99999974E-6 : f32
    %12 = vector.broadcast %cst_4 : f32 to vector<8x1xf32>
    %13 = arith.addf %11, %12 : vector<8x1xf32>
    %14 = math.rsqrt %13 : vector<8x1xf32>
    %15 = vector.broadcast %14 : vector<8x1xf32> to vector<8x32xf32>
    %16 = arith.mulf %6, %15 : vector<8x32xf32>
    %c0_5 = arith.constant 0 : index
    %c0_6 = arith.constant 0 : index
    %17 = vector.load %arg2[%c0_5, %c0_6] : memref<1x32xf32, #tpu.memory_space<vmem>>, vector<1x32xf32>
    %18 = vector.broadcast %17 : vector<1x32xf32> to vector<8x32xf32>
    %19 = arith.mulf %16, %18 : vector<8x32xf32>
    %c0_7 = arith.constant 0 : index
    %c0_8 = arith.constant 0 : index
    %20 = vector.load %arg3[%c0_7, %c0_8] : memref<1x32xf32, #tpu.memory_space<vmem>>, vector<1x32xf32>
    %21 = vector.broadcast %20 : vector<1x32xf32> to vector<8x32xf32>
    %22 = arith.addf %19, %21 : vector<8x32xf32>
    %c0_9 = arith.constant 0 : index
    %c0_10 = arith.constant 0 : index
    %23 = vector.load %arg4[%c0_9, %c0_10] : memref<32x64xf32, #tpu.memory_space<vmem>>, vector<32x64xf32>
    %cst_11 = arith.constant dense<0.000000e+00> : vector<8x64xf32>
    %24 = tpu.matmul %22, %23, %cst_11 {dimension_numbers = #tpu.dot_dimension_numbers<[1], [0], [0], [1], [0, 0, 1, 1], [], []>} : vector<8x32xf32>, vector<32x64xf32>, vector<8x64xf32> -> vector<8x64xf32>
    %c0_12 = arith.constant 0 : index
    %c0_13 = arith.constant 0 : index
    %25 = vector.load %arg5[%c0_12, %c0_13] : memref<1x64xf32, #tpu.memory_space<vmem>>, vector<1x64xf32>
    %26 = vector.broadcast %25 : vector<1x64xf32> to vector<8x64xf32>
    %27 = arith.addf %24, %26 : vector<8x64xf32>
    %cst_14 = arith.constant 5.000000e-01 : f32
    %28 = vector.broadcast %cst_14 : f32 to vector<8x64xf32>
    %29 = arith.mulf %28, %27 : vector<8x64xf32>
    %cst_15 = arith.constant 0.707106769 : f32
    %30 = vector.broadcast %cst_15 : f32 to vector<8x64xf32>
    %31 = arith.mulf %27, %30 : vector<8x64xf32>
    %32 = math.erf %31 : vector<8x64xf32>
    %cst_16 = arith.constant 1.000000e+00 : f32
    %33 = vector.broadcast %cst_16 : f32 to vector<8x64xf32>
    %34 = arith.addf %33, %32 : vector<8x64xf32>
    %35 = arith.mulf %29, %34 : vector<8x64xf32>
    %c0_17 = arith.constant 0 : index
    %c0_18 = arith.constant 0 : index
    %36 = vector.load %arg6[%c0_17, %c0_18] : memref<64x32xf32, #tpu.memory_space<vmem>>, vector<64x32xf32>
    %cst_19 = arith.constant dense<0.000000e+00> : vector<8x32xf32>
    %37 = tpu.matmul %35, %36, %cst_19 {dimension_numbers = #tpu.dot_dimension_numbers<[1], [0], [0], [1], [0, 0, 1, 1], [], []>} : vector<8x64xf32>, vector<64x32xf32>, vector<8x32xf32> -> vector<8x32xf32>
    %c0_20 = arith.constant 0 : index
    %c0_21 = arith.constant 0 : index
    %38 = vector.load %arg7[%c0_20, %c0_21] : memref<1x32xf32, #tpu.memory_space<vmem>>, vector<1x32xf32>
    %39 = vector.broadcast %38 : vector<1x32xf32> to vector<8x32xf32>
    %40 = arith.addf %37, %39 : vector<8x32xf32>
    %c0_22 = arith.constant 0 : index
    %c0_23 = arith.constant 0 : index
    %41 = vector.load %arg1[%c0_22, %c0_23] : memref<8x32xf32, #tpu.memory_space<vmem>>, vector<8x32xf32>
    %42 = arith.addf %40, %41 : vector<8x32xf32>
    %c0_24 = arith.constant 0 : index
    %c0_25 = arith.constant 0 : index
    %43 = vector.load %arg8[%c0_24, %c0_25] : memref<8x32xf32, #tpu.memory_space<vmem>>, vector<8x32xf32>
    tpu.vector_store %arg8[%c0_24, %c0_25], %42 {strides = array<i32>} : memref<8x32xf32, #tpu.memory_space<vmem>>, vector<8x32xf32>,
    return
  }
  func.func @transform_0(%arg0: i32) -> (i32, i32) {
    %c0_i32 = arith.constant 0 : i32
    %c0_i32_0 = arith.constant 0 : i32
    return %arg0, %c0_i32 : i32, i32
  }
  func.func @transform_1(%arg0: i32) -> (i32, i32) {
    %c0_i32 = arith.constant 0 : i32
    %c0_i32_0 = arith.constant 0 : i32
    %c0_i32_1 = arith.constant 0 : i32
    return %c0_i32, %c0_i32_0 : i32, i32
  }
  func.func @transform_2(%arg0: i32) -> (i32, i32) {
    %c0_i32 = arith.constant 0 : i32
    %c0_i32_0 = arith.constant 0 : i32
    %c0_i32_1 = arith.constant 0 : i32
    return %c0_i32, %c0_i32_0 : i32, i32
  }
  func.func @transform_3(%arg0: i32) -> (i32, i32) {
    %c0_i32 = arith.constant 0 : i32
    %c0_i32_0 = arith.constant 0 : i32
    %c0_i32_1 = arith.constant 0 : i32
    return %c0_i32, %c0_i32_0 : i32, i32
  }
  func.func @transform_4(%arg0: i32) -> (i32, i32) {
    %c0_i32 = arith.constant 0 : i32
    %c0_i32_0 = arith.constant 0 : i32
    %c0_i32_1 = arith.constant 0 : i32
    return %c0_i32, %c0_i32_0 : i32, i32
  }
  func.func @transform_5(%arg0: i32) -> (i32, i32) {
    %c0_i32 = arith.constant 0 : i32
    %c0_i32_0 = arith.constant 0 : i32
    %c0_i32_1 = arith.constant 0 : i32
    return %c0_i32, %c0_i32_0 : i32, i32
  }
  func.func @transform_6(%arg0: i32) -> (i32, i32) {
    %c0_i32 = arith.constant 0 : i32
    %c0_i32_0 = arith.constant 0 : i32
    %c0_i32_1 = arith.constant 0 : i32
    return %c0_i32, %c0_i32_0 : i32, i32
  }
  func.func @transform_7(%arg0: i32) -> (i32, i32) {
    %c0_i32 = arith.constant 0 : i32
    %c0_i32_0 = arith.constant 0 : i32
    return %arg0, %c0_i32 : i32, i32
  }
}

module attributes {stable_mosaic.version = 11 : i64} {
  func.func @mlpc_kernel(%arg0: i32, %arg1: memref<8x32xf32, #tpu.memory_space<vmem>>, %arg2: memref<1x32xf32, #tpu.memory_space<vmem>>, %arg3: memref<1x32xf32, #tpu.memory_space<vmem>>, %arg4: memref<32x64xf32, #tpu.memory_space<vmem>>, %arg5: memref<1x64xf32, #tpu.memory_space<vmem>>, %arg6: memref<64x32xf32, #tpu.memory_space<vmem>>, %arg7: memref<1x32xf32, #tpu.memory_space<vmem>>, %arg8: memref<8x32xf32, #tpu.memory_space<vmem>>) attributes {dimension_semantics = [#tpu.dimension_semantics<parallel>], iteration_bounds = array<i64: 2>, scalar_prefetch = 0 : i64, scratch_operands = 0 : i64, tpu.core_type = #tpu.core_type<tc>, window_params = [{transform_indices = @transform_0, window_bounds = array<i64: 8, 32>}, {pipeline_mode = #tpu.pipeline_mode<synchronous>, transform_indices = @transform_1, window_bounds = array<i64: 1, 32>}, {pipeline_mode = #tpu.pipeline_mode<synchronous>, transform_indices = @transform_2, window_bounds = array<i64: 1, 32>}, {pipeline_mode = #tpu.pipeline_mode<synchronous>, transform_indices = @transform_3, window_bounds = array<i64: 32, 64>}, {pipeline_mode = #tpu.pipeline_mode<synchronous>, transform_indices = @transform_4, window_bounds = array<i64: 1, 64>}, {pipeline_mode = #tpu.pipeline_mode<synchronous>, transform_indices = @transform_5, window_bounds = array<i64: 64, 32>}, {pipeline_mode = #tpu.pipeline_mode<synchronous>, transform_indices = @transform_6, window_bounds = array<i64: 1, 32>}, {transform_indices = @transform_7, window_bounds = array<i64: 8, 32>}]} {
    %c0 = arith.constant 0 : index
    %c0_0 = arith.constant 0 : index
    %0 = vector.load %arg1[%c0, %c0_0] : memref<8x32xf32, #tpu.memory_space<vmem>>, vector<8x32xf32>
    %cst = arith.constant dense<0.000000e+00> : vector<8xf32>
    %1 = vector.multi_reduction <add>, %0, %cst [1] : vector<8x32xf32> to vector<8xf32>
    %2 = vector.shape_cast %1 : vector<8xf32> to vector<8x1xf32>
    %cst_1 = arith.constant 3.200000e+01 : f32
    %3 = vector.broadcast %cst_1 : f32 to vector<8x1xf32>
    %4 = arith.divf %2, %3 : vector<8x1xf32>
    %5 = vector.broadcast %4 : vector<8x1xf32> to vector<8x32xf32>
    %6 = arith.subf %0, %5 : vector<8x32xf32>
    %7 = arith.mulf %6, %6 : vector<8x32xf32>
    %cst_2 = arith.constant dense<0.000000e+00> : vector<8xf32>
    %8 = vector.multi_reduction <add>, %7, %cst_2 [1] : vector<8x32xf32> to vector<8xf32>
    %9 = vector.shape_cast %8 : vector<8xf32> to vector<8x1xf32>
    %cst_3 = arith.constant 3.200000e+01 : f32
    %10 = vector.broadcast %cst_3 : f32 to vector<8x1xf32>
    %11 = arith.divf %9, %10 : vector<8x1xf32>
    %cst_4 = arith.constant 9.99999974E-6 : f32
    %12 = vector.broadcast %cst_4 : f32 to vector<8x1xf32>
    %13 = arith.addf %11, %12 : vector<8x1xf32>
    %14 = math.rsqrt %13 : vector<8x1xf32>
    %15 = vector.broadcast %14 : vector<8x1xf32> to vector<8x32xf32>
    %16 = arith.mulf %6, %15 : vector<8x32xf32>
    %c0_5 = arith.constant 0 : index
    %c0_6 = arith.constant 0 : index
    %17 = vector.load %arg2[%c0_5, %c0_6] : memref<1x32xf32, #tpu.memory_space<vmem>>, vector<1x32xf32>
    %18 = vector.broadcast %17 : vector<1x32xf32> to vector<8x32xf32>
    %19 = arith.mulf %16, %18 : vector<8x32xf32>
    %c0_7 = arith.constant 0 : index
    %c0_8 = arith.constant 0 : index
    %20 = vector.load %arg3[%c0_7, %c0_8] : memref<1x32xf32, #tpu.memory_space<vmem>>, vector<1x32xf32>
    %21 = vector.broadcast %20 : vector<1x32xf32> to vector<8x32xf32>
    %22 = arith.addf %19, %21 : vector<8x32xf32>
    %c0_9 = arith.constant 0 : index
    %c0_10 = arith.constant 0 : index
    %23 = vector.load %arg4[%c0_9, %c0_10] : memref<32x64xf32, #tpu.memory_space<vmem>>, vector<32x64xf32>
    %cst_11 = arith.constant dense<0.000000e+00> : vector<8x64xf32>
    %24 = tpu.matmul %22, %23, %cst_11 {dimension_numbers = #tpu.dot_dimension_numbers<[1], [0], [0], [1], [0, 0, 1, 1], [], []>} : vector<8x32xf32>, vector<32x64xf32>, vector<8x64xf32> -> vector<8x64xf32>
    %c0_12 = arith.constant 0 : index
    %c0_13 = arith.constant 0 : index
    %25 = vector.load %arg5[%c0_12, %c0_13] : memref<1x64xf32, #tpu.memory_space<vmem>>, vector<1x64xf32>
    %26 = vector.broadcast %25 : vector<1x64xf32> to vector<8x64xf32>
    %27 = arith.addf %24, %26 : vector<8x64xf32>
    %cst_14 = arith.constant 5.000000e-01 : f32
    %28 = vector.broadcast %cst_14 : f32 to vector<8x64xf32>
    %29 = arith.mulf %28, %27 : vector<8x64xf32>
    %cst_15 = arith.constant 4.471500e-02 : f32
    %30 = vector.broadcast %cst_15 : f32 to vector<8x64xf32>
    %31 = arith.mulf %30, %27 : vector<8x64xf32>
    %32 = arith.mulf %31, %27 : vector<8x64xf32>
    %33 = arith.mulf %32, %27 : vector<8x64xf32>
    %34 = arith.addf %27, %33 : vector<8x64xf32>
    %cst_16 = arith.constant 0.797884583 : f32
    %35 = vector.broadcast %cst_16 : f32 to vector<8x64xf32>
    %36 = arith.mulf %35, %34 : vector<8x64xf32>
    %37 = math.tanh %36 : vector<8x64xf32>
    %cst_17 = arith.constant 1.000000e+00 : f32
    %38 = vector.broadcast %cst_17 : f32 to vector<8x64xf32>
    %39 = arith.addf %38, %37 : vector<8x64xf32>
    %40 = arith.mulf %29, %39 : vector<8x64xf32>
    %c0_18 = arith.constant 0 : index
    %c0_19 = arith.constant 0 : index
    %41 = vector.load %arg6[%c0_18, %c0_19] : memref<64x32xf32, #tpu.memory_space<vmem>>, vector<64x32xf32>
    %cst_20 = arith.constant dense<0.000000e+00> : vector<8x32xf32>
    %42 = tpu.matmul %40, %41, %cst_20 {dimension_numbers = #tpu.dot_dimension_numbers<[1], [0], [0], [1], [0, 0, 1, 1], [], []>} : vector<8x64xf32>, vector<64x32xf32>, vector<8x32xf32> -> vector<8x32xf32>
    %c0_21 = arith.constant 0 : index
    %c0_22 = arith.constant 0 : index
    %43 = vector.load %arg7[%c0_21, %c0_22] : memref<1x32xf32, #tpu.memory_space<vmem>>, vector<1x32xf32>
    %44 = vector.broadcast %43 : vector<1x32xf32> to vector<8x32xf32>
    %45 = arith.addf %42, %44 : vector<8x32xf32>
    %c0_23 = arith.constant 0 : index
    %c0_24 = arith.constant 0 : index
    %46 = vector.load %arg1[%c0_23, %c0_24] : memref<8x32xf32, #tpu.memory_space<vmem>>, vector<8x32xf32>
    %47 = arith.addf %45, %46 : vector<8x32xf32>
    %c0_25 = arith.constant 0 : index
    %c0_26 = arith.constant 0 : index
    %48 = vector.load %arg8[%c0_25, %c0_26] : memref<8x32xf32, #tpu.memory_space<vmem>>, vector<8x32xf32>
    tpu.vector_store %arg8[%c0_25, %c0_26], %47 {strides = array<i32>} : memref<8x32xf32, #tpu.memory_space<vmem>>, vector<8x32xf32>,
    return
  }
  func.func @transform_0(%arg0: i32) -> (i32, i32) {
    %c0_i32 = arith.constant 0 : i32
    %c0_i32_0 = arith.constant 0 : i32
    return %arg0, %c0_i32 : i32, i32
  }
  func.func @transform_1(%arg0: i32) -> (i32, i32) {
    %c0_i32 = arith.constant 0 : i32
    %c0_i32_0 = arith.constant 0 : i32
    %c0_i32_1 = arith.constant 0 : i32
    return %c0_i32, %c0_i32_0 : i32, i32
  }
  func.func @transform_2(%arg0: i32) -> (i32, i32) {
    %c0_i32 = arith.constant 0 : i32
    %c0_i32_0 = arith.constant 0 : i32
    %c0_i32_1 = arith.constant 0 : i32
    return %c0_i32, %c0_i32_0 : i32, i32
  }
  func.func @transform_3(%arg0: i32) -> (i32, i32) {
    %c0_i32 = arith.constant 0 : i32
    %c0_i32_0 = arith.constant 0 : i32
    %c0_i32_1 = arith.constant 0 : i32
    return %c0_i32, %c0_i32_0 : i32, i32
  }
  func.func @transform_4(%arg0: i32) -> (i32, i32) {
    %c0_i32 = arith.constant 0 : i32
    %c0_i32_0 = arith.constant 0 : i32
    %c0_i32_1 = arith.constant 0 : i32
    return %c0_i32, %c0_i32_0 : i32, i32
  }
  func.func @transform_5(%arg0: i32) -> (i32, i32) {
    %c0_i32 = arith.constant 0 : i32
    %c0_i32_0 = arith.constant 0 : i32
    %c0_i32_1 = arith.constant 0 : i32
    return %c0_i32, %c0_i32_0 : i32, i32
  }
  func.func @transform_6(%arg0: i32) -> (i32, i32) {
    %c0_i32 = arith.constant 0 : i32
    %c0_i32_0 = arith.constant 0 : i32
    %c0_i32_1 = arith.constant 0 : i32
    return %c0_i32, %c0_i32_0 : i32, i32
  }
  func.func @transform_7(%arg0: i32) -> (i32, i32) {
    %c0_i32 = arith.constant 0 : i32
    %c0_i32_0 = arith.constant 0 : i32
    return %arg0, %c0_i32 : i32, i32
  }
}

</mosaic_0001>

<bundles_post_ra>
// kernel: _mlpc_call.1
= control target key start
LH: loop header
LB: loop body
LE: loop exit
PB: predicated region body
PF: predicated region fallthrough
CT: control target
= control target key end

     0   :  { %12 = vsyncpa [#allocation3], 0  ;;  %s948_s0 = inlined_call_operand.vmem [shape: f32[16,32], index: 0, kind: input, shape index: {}]   ;;  %s949_s1 = inlined_call_operand.vmem [shape: f32[1,32], index: 1, kind: input, shape index: {}]   ;;  %s950_s2 = inlined_call_operand.vmem [shape: f32[1,32], index: 2, kind: input, shape index: {}]   ;;  %s951_s3 = inlined_call_operand.vmem [shape: f32[32,64], index: 3, kind: input, shape index: {}]   ;;  %s952_s4 = inlined_call_operand.vmem [shape: f32[1,64], index: 4, kind: input, shape index: {}]   ;;  %s953_s5 = inlined_call_operand.vmem [shape: f32[64,32], index: 5, kind: input, shape index: {}]   ;;  %s954_s6 = inlined_call_operand.vmem [shape: f32[1,32], index: 6, kind: input, shape index: {}]   ;;  %s955_s7 = inlined_call_operand.hbm [shape: f32[16,32], index: 7, kind: output, shape index: {}]  }
   0x1   :  { %14 = vsyncpa [#allocation3 + $0x1], 0  ;;  %s791_s24 = smov 0   ;;  %s793_s25 = smov 0  }
   0x2   :  { %s795_s26 = smov 0   ;;  %s797_s27 = smov 0  }
   0x3 LB: > { %s812_s28 = sadd.s32 4294967295, %s745_s27   ;;  %s559_s29 = sadd.s32 4294967294, %s745_s27   ;;  %s745_s27 = sphi %s797_s27, %s961_s27   ;;  %s741_s26 = sphi %s795_s26, %s960_s26   ;;  %s737_s25 = sphi %s793_s25, %s959_s25   ;;  %s733_s24 = sphi %s791_s24, %s958_s24  }
   0x4   : > { %s816_s30 = sadd.s32 1, %s745_s27   ;;  %s179_s8 = sadd.s32 1, %s741_s26 }
   0x5   : > { %s176_s9 = ssub.s32 %s745_s27, %s816_s30  ;;  %p189_p0 = scmp.ne.s32.totalorder %s741_s26, %s737_s25 }
   0x6   : > { %p177_p1 = scmp.eq.s32.totalorder %s176_s9, 0  ;;  %p190_p2 = scmp.eq.s32.totalorder %s812_s28, 1 }
   0x7   : > { %p195_p3 = scmp.ne.s32.totalorder %s737_s25, %s733_s24  ;;  %p196_p4 = scmp.eq.s32.totalorder %s559_s29, 1 }
   0x8   : > { %s827_s10 = scalar_select %p177_p1, %s741_s26, %s179_s8  }
   0x9   : > { %p829_p5 = por %p190_p2, %p189_p0  ;;  %p833_p6 = por %p196_p4, %p195_p3 }
   0xa   : > { %p562_p7 = scmp.ge.s32.totalorder %s745_s27, 1  ;;  %p239_p8 = scmp.lt.s32.totalorder %s745_s27, 3 }
   0xc   : > { %p240_p9 = pnand %p562_p7, %p239_p8 }
   0xd   : > { %p270_p10 = scmp.lt.s32.totalorder (!%p240_p9), %s812_s28, 1  ;;  %vm275_vm0 = vcmask (!%p240_p9), 261120   ;;  %v306_v7 = vld [vmem:[%s951_s3] sm:$0xff] (!%p240_p9)  ;;  %v307_v8 = vld [vmem:[%s951_s3 + $0x8] sm:$0xff] (!%p240_p9)  ;;  %v308_v9 = vld [vmem:[%s951_s3 + $0x10] sm:$0xff] (!%p240_p9)  ;;  %v747_v10 = vmov (!%p240_p9), 0.0|0.0  }
   0xe   : > { %243 = sbr.rel (%p240_p9) target bundleno = 800 (0x320), region = 48  ;;  %619 = vmatprep.subr.bf16.mxu0 (!%p240_p9), %v747_v10  ;;  %v620_v11 = vpack.c.bf16 (!%p240_p9), %v307_v8, %v306_v7  ;;  %v309_v12 = vld [vmem:[%s951_s3 + $0x18] sm:$0xff] (!%p240_p9)  ;;  %vm748_vm1 = vmmov (!%p240_p9), 0   ;;  %v749_v13 = vmov (!%p240_p9), 0.0   ;;  %625 = vmatprep.subr.bf16.mxu1 (!%p240_p9), %v747_v10  ;;  %v565_v19 = vld [vmem:[%s949_s1] ss:$0 sm:$0xff] (!%p240_p9) }
   0xf   : > { %597 = vmatprep.mubr.msk.f32.mxu0 (!%p240_p9), %vm748_vm1, %v749_v13  ;;  %616 = vmatprep.mubr.msk.f32.mxu1 (!%p240_p9), %vm748_vm1, %v749_v13  ;;  %v623_v14 = vpack.c.bf16 (!%p240_p9), %v309_v12, %v308_v9  ;;  %v566_v21 = vld [vmem:[%s950_s2] ss:$0 sm:$0xff] (!%p240_p9)  ;;  %v396_v25 = vld [vmem:[%s953_s5 + $0x8] sm:$0xff] (!%p240_p9)  ;;  %v397_v27 = vld [vmem:[%s953_s5 + $0x10] sm:$0xff] (!%p240_p9)  ;;  %vm410_vm2 = vcmask (!%p240_p9), 523264   ;;  %s267_s20 = sand.u32 (!%p240_p9), 1, %s737_s25  }
  0x10   : > { %621 = vmatpush3.bf16.msra.mxu0 (!%p240_p9), %v620_v11  ;;  %v395_v24 = vld [vmem:[%s953_s5] sm:$0xff] (!%p240_p9)  ;;  %v398_v28 = vld [vmem:[%s953_s5 + $0x18] sm:$0xff] (!%p240_p9)  ;;  %v400_v31 = vld [vmem:[%s953_s5 + $0x28] sm:$0xff] (!%p240_p9)  ;;  %s563_s21 = sshll.u32 (!%p240_p9), %s267_s20, 3  ;;  %s572_s29 = sshll.u32 (!%p240_p9), %s812_s28, 7 }
  0x11   : > { %622 = vmatprep.subr.bf16.mxu0 (!%p240_p9), %v747_v10  ;;  %v626_v26 = vpack.c.bf16 (!%p240_p9), %v396_v25, %v395_v24  ;;  %v629_v29 = vpack.c.bf16 (!%p240_p9), %v398_v28, %v397_v27  ;;  %v399_v30 = vld [vmem:[%s953_s5 + $0x20] sm:$0xff] (!%p240_p9)  ;;  %v401_v33 = vld [vmem:[%s953_s5 + $0x30] sm:$0xff] (!%p240_p9)  ;;  %v402_v34 = vld [vmem:[%s953_s5 + $0x38] sm:$0xff] (!%p240_p9)  ;;  %s269_s8 = scalar_lea.vmem (!%p240_p9), [#allocation2], %s563_s21  ;;  %s905_s15 = scalar_lea.hbm (!%p240_p9), %s955_s7, %s572_s29 }
  0x12   : > { %v632_v32 = vpack.c.bf16 (!%p240_p9), %v400_v31, %v399_v30  ;;  %v635_v35 = vpack.c.bf16 (!%p240_p9), %v402_v34, %v401_v33  ;;  %v567_v36 = vld [vmem:[%s952_s4] ss:$0 sm:$0xff] (!%p240_p9)  ;;  %s500_s9 = sshll.u32 (!%p240_p9), %s269_s8, 4  ;;  %s487_s16 = scalar_lea.sflag (!%p240_p9), [#allocation3], %s267_s20  ;;  %s907_s9 = int_to_ptr.vmem [resolvable:$true] %s500_s9 }
  0x13   : > { %627 = vmatpush3.bf16.msra.mxu1 (!%p240_p9), %v626_v26  ;;  %v569_v45 = vld [vmem:[%s954_s6] ss:$0 sm:$0xff] (!%p240_p9) }
  0x14   : > { %624 = vmatpush3.bf16.msra.mxu0 (!%p240_p9), %v623_v14  ;;  %628 = vmatprep.subr.bf16.mxu1 (!%p240_p9), %v747_v10 }
  0x15   : > { %s271_s13 = scalar_select %p270_p10, %s812_s28, 1 }
  0x16   : > { %s683_s28 = scalar_lea.vmem %s907_s9, 128 }
  0x17   : > { %s564_s14 = sshll.u32 %s271_s13, 3  ;;  %630 = vmatpush3.bf16.msra.mxu1 %v629_v29  ;;  %p684_p11 = scmp.ne.s32.totalorder %s907_s9, %s683_s28 }
  0x18   : > { %s273_s17 = scalar_lea.vmem %s948_s0, %s564_s14  ;;  %631 = vmatprep.subr.bf16.mxu1 %v747_v10 }
  0x19   : > { %v844_v0 = vld [vmem:[%s273_s17] sm:$0xff]  ;;  %p685_p12 = pnand %p684_p11, %p829_p5  ;;  %s750_s17 = smov [#allocation2]  }
  0x1a   : > { %v276_v1 = vsel %vm275_vm0, %v844_v0, 0.0  ;;  %s687_s18 = sshll.u32 %s750_s17, 4  ;;  %s688_s18 = int_to_ptr.vmem [resolvable:$false] %s687_s18 }
  0x1b   : > { %277 = vadd.xlane.f32.xlu0 %v276_v1  ;;  %633 = vmatpush3.bf16.msra.mxu1 %v632_v32  ;;  %p686_p13 = pneg %p685_p12  ;;  %s689_s19 = scalar_lea.vmem %s688_s18, 256 }
  0x1c   : > { %634 = vmatprep.subr.bf16.mxu1 %v747_v10  ;;  %p690_p0 = scmp.lt.s32.totalorder %s907_s9, %s688_s18  ;;  %p691_p1 = scmp.lt.s32.totalorder %s689_s19, %s683_s28 }
  0x1e   : > { %p692_p2 = por %p691_p1, %p690_p0 }
  0x1f   : > { %636 = vmatpush3.bf16.msra.mxu1 %v635_v35 }
  0x20   : > { %p693_p3 = pnand %p692_p2, %p686_p13 }
  0xa8   : > { %v278_v2 = vpop.xlane.xlu0 %277 }
  0xa9   : > { %v280_v3 = vmul.f32 0.03125, %v278_v2 }
  0xab   : > { %v281_v4 = vsub.f32 %v844_v0, %v280_v3 }
  0xad   : > { %v282_v5 = vmul.f32 %v281_v4, %v281_v4 }
  0xaf   : > { %v283_v6 = vsel %vm275_vm0, %v282_v5, 0.0 }
  0xb0   : > { %284 = vadd.xlane.f32.xlu0 %v283_v6 }
 0x13d   : > { %v285_v15 = vpop.xlane.xlu0 %284 }
 0x13e   : > { %v286_v16 = vmul.f32 0.03125, %v285_v15 }
 0x140   : > { %v287_v17 = vadd.f32 1e-05, %v286_v16 }
 0x142   : > { %679 = vrsqrt.f32 %v287_v17 }
 0x14c   : > { %v680_v18 = vpop.eup %679 }
 0x14d   : > { %v289_v20 = vmul.f32 %v680_v18, %v281_v4 }
 0x14f   : > { %v297_v22 = vmul.f32 %v565_v19, %v289_v20 }
 0x151   : > { %v305_v23 = vadd.f32 %v566_v21, %v297_v22 }
 0x153   : > { %598 = vmatmul.mubr.msk.f32.vlgmr.msra.gmra.mrb[0].mxu0 %vm275_vm0, %v305_v23 }
 0x226   : > { %v386_v37 = vpop.f32.mrb[0].mxu0 }
 0x227   : > { %v387_v38 = vadd.f32 %v567_v36, %v386_v37  ;;  %v599_v39 = vpop.f32.mrb[1].mxu0 }
 0x229   : > { %v391_v40 = vmul.f32 0.70710677, %v387_v38  ;;  %v390_v42 = vmul.f32 0.5, %v387_v38 }
 0x22b   : > { %681 = verf.f32 %v391_v40 }
 0x235   : > { %v682_v41 = vpop.eup %681 }
 0x236   : > { %v393_v43 = vadd.f32 1.0, %v682_v41 }
 0x238   : > { %v394_v44 = vmul.f32 %v393_v43, %v390_v42 }
 0x23a   : > { %617 = vmatmul.mubr.msk.f32.vlgmr.msra.gmra.mrb[0].mxu1 %vm410_vm2, %v394_v44 }
 0x30d   : > { %v480_v46 = vpop.f32.mrb[0].mxu1 }
 0x30e   : > { %v481_v47 = vadd.f32 %v569_v45, %v480_v46  ;;  %v618_v48 = vpop.f32.mrb[1].mxu1 }
 0x310   : > { %v484_v49 = vadd.f32 %v481_v47, %v844_v0 }
 0x312   : > { %485 = vst.msk [vmem:[%s269_s8] sm:$0xff] %vm275_vm0, %v484_v49 }
 0x313   : > { %696 = shalt.err (!%p693_p3)
}
 0x314   : > { %s697_s20 = scalar_lea.hbm %s905_s15, 128  ;;  %s701_s23 = scalar_lea.hbm %s955_s7, 256 }
 0x315   : > { %p698_p4 = scmp.ne.s32.totalorder %s905_s15, %s697_s20  ;;  %p702_p9 = scmp.lt.u32.totalorder %s905_s15, %s955_s7 }
 0x316   : > { %p703_p10 = scmp.lt.u32.totalorder %s701_s23, %s697_s20  ;;  %p705_p12 = scmp.lt.u32.totalorder %s697_s20, %s905_s15 }
 0x317   : > { %p699_p7 = pnand %p698_p4, %p829_p5 }
 0x318   : > { %p704_p11 = por %p703_p10, %p702_p9 }
 0x319   : > { %p700_p8 = pneg %p699_p7 }
 0x31a   : > { %p706_p13 = por %p705_p12, %p704_p11 }
 0x31c   : > { %p707_p0 = pnand %p706_p13, %p700_p8 }
 0x31e   : > { %710 = shalt.err (!%p707_p0)
}
 0x31f   : > { %637 = dma.vmem_to_hbm [thread:$0]  (%p829_p5), %s907_s9, 128, %s905_s15, %s487_s16  }
 0x320 PF: > { %p643_p1 = scmp.ge.s32.totalorder %s745_s27, 2  ;;  %s512_s13 = sand.u32 1, %s733_s24  }
 0x321   : > { %s513_s14 = scalar_lea.sflag [#allocation3], %s512_s13 }
 0x322   : > { %p640_p2 = pnand %p643_p1, %p833_p6 }
 0x324   : > { %728 = dma.done.wait (!%p640_p2), %s513_s14, 128  }
 0x325   : > { %730 = vsyncadd (!%p640_p2), %s513_s14, 4294967168  ;;  %p17_p3 = scmp.ge.s32.totalorder %s816_s30, 4   ;;  %s958_s24 = smov %s737_s25 }
 0x326   : > { %s959_s25 = smov %s741_s26  ;;  %s960_s26 = smov %s827_s10 }
 0x327   : > { %s961_s27 = smov %s816_s30  ;;  %19 = sbr.rel (!%p17_p3) target bundleno = 3 (0x3), region = 83 }
 0x32e   :  { %518 = vsyncpa [#allocation3], 1 }
 0x32f   :  { %520 = vsyncpa [#allocation3 + $0x1], 1 }

// kernel: _mlpc_call.1
= control target key start
LH: loop header
LB: loop body
LE: loop exit
PB: predicated region body
PF: predicated region fallthrough
CT: control target
= control target key end

     0   :  { %12 = vsyncpa [#allocation3], 0  ;;  %s948_s0 = inlined_call_operand.vmem [shape: f32[16,32], index: 0, kind: input, shape index: {}]   ;;  %s949_s1 = inlined_call_operand.vmem [shape: f32[1,32], index: 1, kind: input, shape index: {}]   ;;  %s950_s2 = inlined_call_operand.vmem [shape: f32[1,32], index: 2, kind: input, shape index: {}]   ;;  %s951_s3 = inlined_call_operand.vmem [shape: f32[32,64], index: 3, kind: input, shape index: {}]   ;;  %s952_s4 = inlined_call_operand.vmem [shape: f32[1,64], index: 4, kind: input, shape index: {}]   ;;  %s953_s5 = inlined_call_operand.vmem [shape: f32[64,32], index: 5, kind: input, shape index: {}]   ;;  %s954_s6 = inlined_call_operand.vmem [shape: f32[1,32], index: 6, kind: input, shape index: {}]   ;;  %s955_s7 = inlined_call_operand.hbm [shape: f32[16,32], index: 7, kind: output, shape index: {}]  }
   0x1   :  { %14 = vsyncpa [#allocation3 + $0x1], 0  ;;  %s791_s24 = smov 0   ;;  %s793_s25 = smov 0  }
   0x2   :  { %s795_s26 = smov 0   ;;  %s797_s27 = smov 0  }
   0x3 LB: > { %s812_s28 = sadd.s32 4294967295, %s745_s27   ;;  %s559_s29 = sadd.s32 4294967294, %s745_s27   ;;  %s745_s27 = sphi %s797_s27, %s961_s27   ;;  %s741_s26 = sphi %s795_s26, %s960_s26   ;;  %s737_s25 = sphi %s793_s25, %s959_s25   ;;  %s733_s24 = sphi %s791_s24, %s958_s24  }
   0x4   : > { %s816_s30 = sadd.s32 1, %s745_s27   ;;  %s179_s8 = sadd.s32 1, %s741_s26 }
   0x5   : > { %s176_s9 = ssub.s32 %s745_s27, %s816_s30  ;;  %p189_p0 = scmp.ne.s32.totalorder %s741_s26, %s737_s25 }
   0x6   : > { %p177_p1 = scmp.eq.s32.totalorder %s176_s9, 0  ;;  %p190_p2 = scmp.eq.s32.totalorder %s812_s28, 1 }
   0x7   : > { %p195_p3 = scmp.ne.s32.totalorder %s737_s25, %s733_s24  ;;  %p196_p4 = scmp.eq.s32.totalorder %s559_s29, 1 }
   0x8   : > { %s827_s10 = scalar_select %p177_p1, %s741_s26, %s179_s8  }
   0x9   : > { %p829_p5 = por %p190_p2, %p189_p0  ;;  %p833_p6 = por %p196_p4, %p195_p3 }
   0xa   : > { %p562_p7 = scmp.ge.s32.totalorder %s745_s27, 1  ;;  %p239_p8 = scmp.lt.s32.totalorder %s745_s27, 3 }
   0xc   : > { %p240_p9 = pnand %p562_p7, %p239_p8 }
   0xd   : > { %p270_p10 = scmp.lt.s32.totalorder (!%p240_p9), %s812_s28, 1  ;;  %vm275_vm0 = vcmask (!%p240_p9), 261120   ;;  %v306_v7 = vld [vmem:[%s951_s3] sm:$0xff] (!%p240_p9)  ;;  %v307_v8 = vld [vmem:[%s951_s3 + $0x8] sm:$0xff] (!%p240_p9)  ;;  %v308_v9 = vld [vmem:[%s951_s3 + $0x10] sm:$0xff] (!%p240_p9)  ;;  %v747_v10 = vmov (!%p240_p9), 0.0|0.0  }
   0xe   : > { %243 = sbr.rel (%p240_p9) target bundleno = 800 (0x320), region = 48  ;;  %619 = vmatprep.subr.bf16.mxu0 (!%p240_p9), %v747_v10  ;;  %v620_v11 = vpack.c.bf16 (!%p240_p9), %v307_v8, %v306_v7  ;;  %v309_v12 = vld [vmem:[%s951_s3 + $0x18] sm:$0xff] (!%p240_p9)  ;;  %vm748_vm1 = vmmov (!%p240_p9), 0   ;;  %v749_v13 = vmov (!%p240_p9), 0.0   ;;  %625 = vmatprep.subr.bf16.mxu1 (!%p240_p9), %v747_v10  ;;  %v565_v19 = vld [vmem:[%s949_s1] ss:$0 sm:$0xff] (!%p240_p9) }
   0xf   : > { %597 = vmatprep.mubr.msk.f32.mxu0 (!%p240_p9), %vm748_vm1, %v749_v13  ;;  %616 = vmatprep.mubr.msk.f32.mxu1 (!%p240_p9), %vm748_vm1, %v749_v13  ;;  %v623_v14 = vpack.c.bf16 (!%p240_p9), %v309_v12, %v308_v9  ;;  %v566_v21 = vld [vmem:[%s950_s2] ss:$0 sm:$0xff] (!%p240_p9)  ;;  %v396_v25 = vld [vmem:[%s953_s5 + $0x8] sm:$0xff] (!%p240_p9)  ;;  %v397_v27 = vld [vmem:[%s953_s5 + $0x10] sm:$0xff] (!%p240_p9)  ;;  %vm410_vm2 = vcmask (!%p240_p9), 523264   ;;  %s267_s20 = sand.u32 (!%p240_p9), 1, %s737_s25  }
  0x10   : > { %621 = vmatpush3.bf16.msra.mxu0 (!%p240_p9), %v620_v11  ;;  %v395_v24 = vld [vmem:[%s953_s5] sm:$0xff] (!%p240_p9)  ;;  %v398_v28 = vld [vmem:[%s953_s5 + $0x18] sm:$0xff] (!%p240_p9)  ;;  %v400_v31 = vld [vmem:[%s953_s5 + $0x28] sm:$0xff] (!%p240_p9)  ;;  %s563_s21 = sshll.u32 (!%p240_p9), %s267_s20, 3  ;;  %s572_s29 = sshll.u32 (!%p240_p9), %s812_s28, 7 }
  0x11   : > { %622 = vmatprep.subr.bf16.mxu0 (!%p240_p9), %v747_v10  ;;  %v626_v26 = vpack.c.bf16 (!%p240_p9), %v396_v25, %v395_v24  ;;  %v629_v29 = vpack.c.bf16 (!%p240_p9), %v398_v28, %v397_v27  ;;  %v399_v30 = vld [vmem:[%s953_s5 + $0x20] sm:$0xff] (!%p240_p9)  ;;  %v401_v33 = vld [vmem:[%s953_s5 + $0x30] sm:$0xff] (!%p240_p9)  ;;  %v402_v34 = vld [vmem:[%s953_s5 + $0x38] sm:$0xff] (!%p240_p9)  ;;  %s269_s8 = scalar_lea.vmem (!%p240_p9), [#allocation2], %s563_s21  ;;  %s905_s15 = scalar_lea.hbm (!%p240_p9), %s955_s7, %s572_s29 }
  0x12   : > { %v632_v32 = vpack.c.bf16 (!%p240_p9), %v400_v31, %v399_v30  ;;  %v635_v35 = vpack.c.bf16 (!%p240_p9), %v402_v34, %v401_v33  ;;  %v567_v36 = vld [vmem:[%s952_s4] ss:$0 sm:$0xff] (!%p240_p9)  ;;  %s500_s9 = sshll.u32 (!%p240_p9), %s269_s8, 4  ;;  %s487_s16 = scalar_lea.sflag (!%p240_p9), [#allocation3], %s267_s20  ;;  %s907_s9 = int_to_ptr.vmem [resolvable:$true] %s500_s9 }
  0x13   : > { %627 = vmatpush3.bf16.msra.mxu1 (!%p240_p9), %v626_v26  ;;  %v569_v45 = vld [vmem:[%s954_s6] ss:$0 sm:$0xff] (!%p240_p9) }
  0x14   : > { %624 = vmatpush3.bf16.msra.mxu0 (!%p240_p9), %v623_v14  ;;  %628 = vmatprep.subr.bf16.mxu1 (!%p240_p9), %v747_v10 }
  0x15   : > { %s271_s13 = scalar_select %p270_p10, %s812_s28, 1 }
  0x16   : > { %s683_s28 = scalar_lea.vmem %s907_s9, 128 }
  0x17   : > { %s564_s14 = sshll.u32 %s271_s13, 3  ;;  %630 = vmatpush3.bf16.msra.mxu1 %v629_v29  ;;  %p684_p11 = scmp.ne.s32.totalorder %s907_s9, %s683_s28 }
  0x18   : > { %s273_s17 = scalar_lea.vmem %s948_s0, %s564_s14  ;;  %631 = vmatprep.subr.bf16.mxu1 %v747_v10 }
  0x19   : > { %v844_v0 = vld [vmem:[%s273_s17] sm:$0xff]  ;;  %p685_p12 = pnand %p684_p11, %p829_p5  ;;  %s750_s17 = smov [#allocation2]  }
  0x1a   : > { %v276_v1 = vsel %vm275_vm0, %v844_v0, 0.0  ;;  %s687_s18 = sshll.u32 %s750_s17, 4  ;;  %s688_s18 = int_to_ptr.vmem [resolvable:$false] %s687_s18 }
  0x1b   : > { %277 = vadd.xlane.f32.xlu0 %v276_v1  ;;  %633 = vmatpush3.bf16.msra.mxu1 %v632_v32  ;;  %p686_p13 = pneg %p685_p12  ;;  %s689_s19 = scalar_lea.vmem %s688_s18, 256 }
  0x1c   : > { %634 = vmatprep.subr.bf16.mxu1 %v747_v10  ;;  %p690_p0 = scmp.lt.s32.totalorder %s907_s9, %s688_s18  ;;  %p691_p1 = scmp.lt.s32.totalorder %s689_s19, %s683_s28 }
  0x1e   : > { %p692_p2 = por %p691_p1, %p690_p0 }
  0x1f   : > { %636 = vmatpush3.bf16.msra.mxu1 %v635_v35 }
  0x20   : > { %p693_p3 = pnand %p692_p2, %p686_p13 }
  0xa8   : > { %v278_v2 = vpop.xlane.xlu0 %277 }
  0xa9   : > { %v280_v3 = vmul.f32 0.03125, %v278_v2 }
  0xab   : > { %v281_v4 = vsub.f32 %v844_v0, %v280_v3 }
  0xad   : > { %v282_v5 = vmul.f32 %v281_v4, %v281_v4 }
  0xaf   : > { %v283_v6 = vsel %vm275_vm0, %v282_v5, 0.0 }
  0xb0   : > { %284 = vadd.xlane.f32.xlu0 %v283_v6 }
 0x13d   : > { %v285_v15 = vpop.xlane.xlu0 %284 }
 0x13e   : > { %v286_v16 = vmul.f32 0.03125, %v285_v15 }
 0x140   : > { %v287_v17 = vadd.f32 1e-05, %v286_v16 }
 0x142   : > { %679 = vrsqrt.f32 %v287_v17 }
 0x14c   : > { %v680_v18 = vpop.eup %679 }
 0x14d   : > { %v289_v20 = vmul.f32 %v680_v18, %v281_v4 }
 0x14f   : > { %v297_v22 = vmul.f32 %v565_v19, %v289_v20 }
 0x151   : > { %v305_v23 = vadd.f32 %v566_v21, %v297_v22 }
 0x153   : > { %598 = vmatmul.mubr.msk.f32.vlgmr.msra.gmra.mrb[0].mxu0 %vm275_vm0, %v305_v23 }
 0x226   : > { %v386_v37 = vpop.f32.mrb[0].mxu0 }
 0x227   : > { %v387_v38 = vadd.f32 %v567_v36, %v386_v37  ;;  %v599_v39 = vpop.f32.mrb[1].mxu0 }
 0x229   : > { %v391_v40 = vmul.f32 0.70710677, %v387_v38  ;;  %v390_v42 = vmul.f32 0.5, %v387_v38 }
 0x22b   : > { %681 = verf.f32 %v391_v40 }
 0x235   : > { %v682_v41 = vpop.eup %681 }
 0x236   : > { %v393_v43 = vadd.f32 1.0, %v682_v41 }
 0x238   : > { %v394_v44 = vmul.f32 %v393_v43, %v390_v42 }
 0x23a   : > { %617 = vmatmul.mubr.msk.f32.vlgmr.msra.gmra.mrb[0].mxu1 %vm410_vm2, %v394_v44 }
 0x30d   : > { %v480_v46 = vpop.f32.mrb[0].mxu1 }
 0x30e   : > { %v481_v47 = vadd.f32 %v569_v45, %v480_v46  ;;  %v618_v48 = vpop.f32.mrb[1].mxu1 }
 0x310   : > { %v484_v49 = vadd.f32 %v481_v47, %v844_v0 }
 0x312   : > { %485 = vst.msk [vmem:[%s269_s8] sm:$0xff] %vm275_vm0, %v484_v49 }
 0x313   : > { %696 = shalt.err (!%p693_p3)
}
 0x314   : > { %s697_s20 = scalar_lea.hbm %s905_s15, 128  ;;  %s701_s23 = scalar_lea.hbm %s955_s7, 256 }
 0x315   : > { %p698_p4 = scmp.ne.s32.totalorder %s905_s15, %s697_s20  ;;  %p702_p9 = scmp.lt.u32.totalorder %s905_s15, %s955_s7 }
 0x316   : > { %p703_p10 = scmp.lt.u32.totalorder %s701_s23, %s697_s20  ;;  %p705_p12 = scmp.lt.u32.totalorder %s697_s20, %s905_s15 }
 0x317   : > { %p699_p7 = pnand %p698_p4, %p829_p5 }
 0x318   : > { %p704_p11 = por %p703_p10, %p702_p9 }
 0x319   : > { %p700_p8 = pneg %p699_p7 }
 0x31a   : > { %p706_p13 = por %p705_p12, %p704_p11 }
 0x31c   : > { %p707_p0 = pnand %p706_p13, %p700_p8 }
 0x31e   : > { %710 = shalt.err (!%p707_p0)
}
 0x31f   : > { %637 = dma.vmem_to_hbm [thread:$0]  (%p829_p5), %s907_s9, 128, %s905_s15, %s487_s16  }
 0x320 PF: > { %p643_p1 = scmp.ge.s32.totalorder %s745_s27, 2  ;;  %s512_s13 = sand.u32 1, %s733_s24  }
 0x321   : > { %s513_s14 = scalar_lea.sflag [#allocation3], %s512_s13 }
 0x322   : > { %p640_p2 = pnand %p643_p1, %p833_p6 }
 0x324   : > { %728 = dma.done.wait (!%p640_p2), %s513_s14, 128  }
 0x325   : > { %730 = vsyncadd (!%p640_p2), %s513_s14, 4294967168  ;;  %p17_p3 = scmp.ge.s32.totalorder %s816_s30, 4   ;;  %s958_s24 = smov %s737_s25 }
 0x326   : > { %s959_s25 = smov %s741_s26  ;;  %s960_s26 = smov %s827_s10 }
 0x327   : > { %s961_s27 = smov %s816_s30  ;;  %19 = sbr.rel (!%p17_p3) target bundleno = 3 (0x3), region = 83 }
 0x32e   :  { %518 = vsyncpa [#allocation3], 1 }
 0x32f   :  { %520 = vsyncpa [#allocation3 + $0x1], 1 }

// kernel: _mlpc_call.1
= control target key start
LH: loop header
LB: loop body
LE: loop exit
PB: predicated region body
PF: predicated region fallthrough
CT: control target
= control target key end

     0   :  { %12 = vsyncpa [#allocation3], 0  ;;  %s952_s0 = inlined_call_operand.vmem [shape: f32[16,32], index: 0, kind: input, shape index: {}]   ;;  %s953_s1 = inlined_call_operand.vmem [shape: f32[1,32], index: 1, kind: input, shape index: {}]   ;;  %s954_s2 = inlined_call_operand.vmem [shape: f32[1,32], index: 2, kind: input, shape index: {}]   ;;  %s955_s3 = inlined_call_operand.vmem [shape: f32[32,64], index: 3, kind: input, shape index: {}]   ;;  %s956_s4 = inlined_call_operand.vmem [shape: f32[1,64], index: 4, kind: input, shape index: {}]   ;;  %s957_s5 = inlined_call_operand.vmem [shape: f32[64,32], index: 5, kind: input, shape index: {}]   ;;  %s958_s6 = inlined_call_operand.vmem [shape: f32[1,32], index: 6, kind: input, shape index: {}]   ;;  %s959_s7 = inlined_call_operand.hbm [shape: f32[16,32], index: 7, kind: output, shape index: {}]  }
   0x1   :  { %14 = vsyncpa [#allocation3 + $0x1], 0  ;;  %s795_s24 = smov 0   ;;  %s797_s25 = smov 0  }
   0x2   :  { %s799_s26 = smov 0   ;;  %s801_s27 = smov 0  }
   0x3 LB: > { %s816_s28 = sadd.s32 4294967295, %s749_s27   ;;  %s563_s29 = sadd.s32 4294967294, %s749_s27   ;;  %s749_s27 = sphi %s801_s27, %s965_s27   ;;  %s745_s26 = sphi %s799_s26, %s964_s26   ;;  %s741_s25 = sphi %s797_s25, %s963_s25   ;;  %s737_s24 = sphi %s795_s24, %s962_s24  }
   0x4   : > { %s820_s30 = sadd.s32 1, %s749_s27   ;;  %s179_s8 = sadd.s32 1, %s745_s26 }
   0x5   : > { %s176_s9 = ssub.s32 %s749_s27, %s820_s30  ;;  %p189_p0 = scmp.ne.s32.totalorder %s745_s26, %s741_s25 }
   0x6   : > { %p177_p1 = scmp.eq.s32.totalorder %s176_s9, 0  ;;  %p190_p2 = scmp.eq.s32.totalorder %s816_s28, 1 }
   0x7   : > { %p195_p3 = scmp.ne.s32.totalorder %s741_s25, %s737_s24  ;;  %p196_p4 = scmp.eq.s32.totalorder %s563_s29, 1 }
   0x8   : > { %s831_s10 = scalar_select %p177_p1, %s745_s26, %s179_s8  }
   0x9   : > { %p833_p5 = por %p190_p2, %p189_p0  ;;  %p837_p6 = por %p196_p4, %p195_p3 }
   0xa   : > { %p566_p7 = scmp.ge.s32.totalorder %s749_s27, 1  ;;  %p239_p8 = scmp.lt.s32.totalorder %s749_s27, 3 }
   0xc   : > { %p240_p9 = pnand %p566_p7, %p239_p8 }
   0xd   : > { %p270_p10 = scmp.lt.s32.totalorder (!%p240_p9), %s816_s28, 1  ;;  %vm275_vm0 = vcmask (!%p240_p9), 261120   ;;  %v306_v7 = vld [vmem:[%s955_s3] sm:$0xff] (!%p240_p9)  ;;  %v307_v8 = vld [vmem:[%s955_s3 + $0x8] sm:$0xff] (!%p240_p9)  ;;  %v308_v9 = vld [vmem:[%s955_s3 + $0x10] sm:$0xff] (!%p240_p9)  ;;  %v751_v10 = vmov (!%p240_p9), 0.0|0.0  }
   0xe   : > { %243 = sbr.rel (%p240_p9) target bundleno = 808 (0x328), region = 48  ;;  %623 = vmatprep.subr.bf16.mxu0 (!%p240_p9), %v751_v10  ;;  %v624_v11 = vpack.c.bf16 (!%p240_p9), %v307_v8, %v306_v7  ;;  %v309_v12 = vld [vmem:[%s955_s3 + $0x18] sm:$0xff] (!%p240_p9)  ;;  %vm752_vm1 = vmmov (!%p240_p9), 0   ;;  %v753_v13 = vmov (!%p240_p9), 0.0   ;;  %629 = vmatprep.subr.bf16.mxu1 (!%p240_p9), %v751_v10  ;;  %v569_v19 = vld [vmem:[%s953_s1] ss:$0 sm:$0xff] (!%p240_p9) }
   0xf   : > { %601 = vmatprep.mubr.msk.f32.mxu0 (!%p240_p9), %vm752_vm1, %v753_v13  ;;  %620 = vmatprep.mubr.msk.f32.mxu1 (!%p240_p9), %vm752_vm1, %v753_v13  ;;  %v627_v14 = vpack.c.bf16 (!%p240_p9), %v309_v12, %v308_v9  ;;  %v570_v21 = vld [vmem:[%s954_s2] ss:$0 sm:$0xff] (!%p240_p9)  ;;  %v400_v25 = vld [vmem:[%s957_s5 + $0x8] sm:$0xff] (!%p240_p9)  ;;  %v401_v26 = vld [vmem:[%s957_s5 + $0x10] sm:$0xff] (!%p240_p9)  ;;  %vm414_vm2 = vcmask (!%p240_p9), 523264   ;;  %s267_s20 = sand.u32 (!%p240_p9), 1, %s741_s25  }
  0x10   : > { %625 = vmatpush3.bf16.msra.mxu0 (!%p240_p9), %v624_v11  ;;  %v399_v24 = vld [vmem:[%s957_s5] sm:$0xff] (!%p240_p9)  ;;  %v402_v28 = vld [vmem:[%s957_s5 + $0x18] sm:$0xff] (!%p240_p9)  ;;  %v404_v31 = vld [vmem:[%s957_s5 + $0x28] sm:$0xff] (!%p240_p9)  ;;  %s567_s21 = sshll.u32 (!%p240_p9), %s267_s20, 3  ;;  %s576_s29 = sshll.u32 (!%p240_p9), %s816_s28, 7 }
  0x11   : > { %626 = vmatprep.subr.bf16.mxu0 (!%p240_p9), %v751_v10  ;;  %v630_v27 = vpack.c.bf16 (!%p240_p9), %v400_v25, %v399_v24  ;;  %v633_v29 = vpack.c.bf16 (!%p240_p9), %v402_v28, %v401_v26  ;;  %v403_v30 = vld [vmem:[%s957_s5 + $0x20] sm:$0xff] (!%p240_p9)  ;;  %v405_v33 = vld [vmem:[%s957_s5 + $0x30] sm:$0xff] (!%p240_p9)  ;;  %v406_v34 = vld [vmem:[%s957_s5 + $0x38] sm:$0xff] (!%p240_p9)  ;;  %s269_s8 = scalar_lea.vmem (!%p240_p9), [#allocation2], %s567_s21  ;;  %s909_s15 = scalar_lea.hbm (!%p240_p9), %s959_s7, %s576_s29 }
  0x12   : > { %v636_v32 = vpack.c.bf16 (!%p240_p9), %v404_v31, %v403_v30  ;;  %v639_v35 = vpack.c.bf16 (!%p240_p9), %v406_v34, %v405_v33  ;;  %v571_v36 = vld [vmem:[%s956_s4] ss:$0 sm:$0xff] (!%p240_p9)  ;;  %s504_s9 = sshll.u32 (!%p240_p9), %s269_s8, 4  ;;  %s491_s16 = scalar_lea.sflag (!%p240_p9), [#allocation3], %s267_s20  ;;  %s911_s9 = int_to_ptr.vmem [resolvable:$true] %s504_s9 }
  0x13   : > { %631 = vmatpush3.bf16.msra.mxu1 (!%p240_p9), %v630_v27  ;;  %v573_v49 = vld [vmem:[%s958_s6] ss:$0 sm:$0xff] (!%p240_p9) }
  0x14   : > { %628 = vmatpush3.bf16.msra.mxu0 (!%p240_p9), %v627_v14  ;;  %632 = vmatprep.subr.bf16.mxu1 (!%p240_p9), %v751_v10 }
  0x15   : > { %s271_s13 = scalar_select %p270_p10, %s816_s28, 1 }
  0x16   : > { %s687_s28 = scalar_lea.vmem %s911_s9, 128 }
  0x17   : > { %s568_s14 = sshll.u32 %s271_s13, 3  ;;  %634 = vmatpush3.bf16.msra.mxu1 %v633_v29  ;;  %p688_p11 = scmp.ne.s32.totalorder %s911_s9, %s687_s28 }
  0x18   : > { %s273_s17 = scalar_lea.vmem %s952_s0, %s568_s14  ;;  %635 = vmatprep.subr.bf16.mxu1 %v751_v10 }
  0x19   : > { %v848_v0 = vld [vmem:[%s273_s17] sm:$0xff]  ;;  %p689_p12 = pnand %p688_p11, %p833_p5  ;;  %s754_s17 = smov [#allocation2]  }
  0x1a   : > { %v276_v1 = vsel %vm275_vm0, %v848_v0, 0.0  ;;  %s691_s18 = sshll.u32 %s754_s17, 4  ;;  %s692_s18 = int_to_ptr.vmem [resolvable:$false] %s691_s18 }
  0x1b   : > { %277 = vadd.xlane.f32.xlu0 %v276_v1  ;;  %637 = vmatpush3.bf16.msra.mxu1 %v636_v32  ;;  %p690_p13 = pneg %p689_p12  ;;  %s693_s19 = scalar_lea.vmem %s692_s18, 256 }
  0x1c   : > { %638 = vmatprep.subr.bf16.mxu1 %v751_v10  ;;  %p694_p0 = scmp.lt.s32.totalorder %s911_s9, %s692_s18  ;;  %p695_p1 = scmp.lt.s32.totalorder %s693_s19, %s687_s28 }
  0x1e   : > { %p696_p2 = por %p695_p1, %p694_p0 }
  0x1f   : > { %640 = vmatpush3.bf16.msra.mxu1 %v639_v35 }
  0x20   : > { %p697_p3 = pnand %p696_p2, %p690_p13 }
  0xa8   : > { %v278_v2 = vpop.xlane.xlu0 %277 }
  0xa9   : > { %v280_v3 = vmul.f32 0.03125, %v278_v2 }
  0xab   : > { %v281_v4 = vsub.f32 %v848_v0, %v280_v3 }
  0xad   : > { %v282_v5 = vmul.f32 %v281_v4, %v281_v4 }
  0xaf   : > { %v283_v6 = vsel %vm275_vm0, %v282_v5, 0.0 }
  0xb0   : > { %284 = vadd.xlane.f32.xlu0 %v283_v6 }
 0x13d   : > { %v285_v15 = vpop.xlane.xlu0 %284 }
 0x13e   : > { %v286_v16 = vmul.f32 0.03125, %v285_v15 }
 0x140   : > { %v287_v17 = vadd.f32 1e-05, %v286_v16 }
 0x142   : > { %683 = vrsqrt.f32 %v287_v17 }
 0x14c   : > { %v684_v18 = vpop.eup %683 }
 0x14d   : > { %v289_v20 = vmul.f32 %v684_v18, %v281_v4 }
 0x14f   : > { %v297_v22 = vmul.f32 %v569_v19, %v289_v20 }
 0x151   : > { %v305_v23 = vadd.f32 %v570_v21, %v297_v22 }
 0x153   : > { %602 = vmatmul.mubr.msk.f32.vlgmr.msra.gmra.mrb[0].mxu0 %vm275_vm0, %v305_v23 }
 0x226   : > { %v386_v37 = vpop.f32.mrb[0].mxu0 }
 0x227   : > { %v387_v38 = vadd.f32 %v571_v36, %v386_v37  ;;  %v603_v39 = vpop.f32.mrb[1].mxu0 }
 0x229   : > { %v391_v40 = vmul.f32 0.044715, %v387_v38  ;;  %v390_v46 = vmul.f32 0.5, %v387_v38 }
 0x22b   : > { %v392_v41 = vmul.f32 %v391_v40, %v387_v38 }
 0x22d   : > { %v393_v42 = vmul.f32 %v392_v41, %v387_v38 }
 0x22f   : > { %v394_v43 = vadd.f32 %v393_v42, %v387_v38 }
 0x231   : > { %v395_v44 = vmul.f32 0.7978846, %v394_v43 }
 0x233   : > { %685 = vtanh.f32 %v395_v44 }
 0x23d   : > { %v686_v45 = vpop.eup %685 }
 0x23e   : > { %v397_v47 = vadd.f32 1.0, %v686_v45 }
 0x240   : > { %v398_v48 = vmul.f32 %v397_v47, %v390_v46 }
 0x242   : > { %621 = vmatmul.mubr.msk.f32.vlgmr.msra.gmra.mrb[0].mxu1 %vm414_vm2, %v398_v48 }
 0x315   : > { %v484_v50 = vpop.f32.mrb[0].mxu1 }
 0x316   : > { %v485_v51 = vadd.f32 %v573_v49, %v484_v50  ;;  %v622_v52 = vpop.f32.mrb[1].mxu1 }
 0x318   : > { %v488_v53 = vadd.f32 %v485_v51, %v848_v0 }
 0x31a   : > { %489 = vst.msk [vmem:[%s269_s8] sm:$0xff] %vm275_vm0, %v488_v53 }
 0x31b   : > { %700 = shalt.err (!%p697_p3)
}
 0x31c   : > { %s701_s20 = scalar_lea.hbm %s909_s15, 128  ;;  %s705_s23 = scalar_lea.hbm %s959_s7, 256 }
 0x31d   : > { %p702_p4 = scmp.ne.s32.totalorder %s909_s15, %s701_s20  ;;  %p706_p9 = scmp.lt.u32.totalorder %s909_s15, %s959_s7 }
 0x31e   : > { %p707_p10 = scmp.lt.u32.totalorder %s705_s23, %s701_s20  ;;  %p709_p12 = scmp.lt.u32.totalorder %s701_s20, %s909_s15 }
 0x31f   : > { %p703_p7 = pnand %p702_p4, %p833_p5 }
 0x320   : > { %p708_p11 = por %p707_p10, %p706_p9 }
 0x321   : > { %p704_p8 = pneg %p703_p7 }
 0x322   : > { %p710_p13 = por %p709_p12, %p708_p11 }
 0x324   : > { %p711_p0 = pnand %p710_p13, %p704_p8 }
 0x326   : > { %714 = shalt.err (!%p711_p0)
}
 0x327   : > { %641 = dma.vmem_to_hbm [thread:$0]  (%p833_p5), %s911_s9, 128, %s909_s15, %s491_s16  }
 0x328 PF: > { %p647_p1 = scmp.ge.s32.totalorder %s749_s27, 2  ;;  %s516_s13 = sand.u32 1, %s737_s24  }
 0x329   : > { %s517_s14 = scalar_lea.sflag [#allocation3], %s516_s13 }
 0x32a   : > { %p644_p2 = pnand %p647_p1, %p837_p6 }
 0x32c   : > { %732 = dma.done.wait (!%p644_p2), %s517_s14, 128  }
 0x32d   : > { %734 = vsyncadd (!%p644_p2), %s517_s14, 4294967168  ;;  %p17_p3 = scmp.ge.s32.totalorder %s820_s30, 4   ;;  %s962_s24 = smov %s741_s25 }
 0x32e   : > { %s963_s25 = smov %s745_s26  ;;  %s964_s26 = smov %s831_s10 }
 0x32f   : > { %s965_s27 = smov %s820_s30  ;;  %19 = sbr.rel (!%p17_p3) target bundleno = 3 (0x3), region = 83 }
 0x336   :  { %522 = vsyncpa [#allocation3], 1 }
 0x337   :  { %524 = vsyncpa [#allocation3 + $0x1], 1 }

</bundles_post_ra>
